<compile_context>
chip_gen: v5e
topology: v5e:2x2
jax: 0.10.0
libtpu: 0.0.40
codegen_flags: <defaults>
</compile_context>

<pallas_src>
import numpy as np

import jax
import jax.numpy as jnp
from jax.experimental import pallas as pl
from jax.experimental.pallas import tpu as pltpu


# ---------------------------------------------------------------------------
# Constant matrices, cached by (H, W) so repeated forwards don't rebuild them.
# ---------------------------------------------------------------------------
_CONST_CACHE = {}


def _coord_constants(H, W):
    key = (H, W)
    if key not in _CONST_CACHE:
        N = H * W
        n = np.arange(N)
        h_idx = n // W                                   # (N,)
        w_idx = n % W                                    # (N,)
        rows = np.arange(H + W)                          # (H+W,)
        # 0/1 pooling matrix (exact in bf16): column j<H selects row h(n)==j,
        # column H+w selects w(n)==w.  Mean scales applied separately in f32.
        apool = ((h_idx[:, None] == rows[None, :])
                 | ((H + w_idx)[:, None] == rows[None, :])).astype(np.float32)   # (N, H+W)
        # 0/1 expansion matrices: (C,H)->(C,N) and (C,W)->(C,N).
        eh = (rows[:, None] == h_idx[None, :]).astype(np.float32)                # (H+W, N)
        ew = (rows[:, None] == (H + w_idx)[None, :]).astype(np.float32)          # (H+W, N)
        colscale = np.concatenate([np.full(H, 1.0 / W, np.float32),
                                   np.full(W, 1.0 / H, np.float32)])[None, :]    # (1, H+W)
        _CONST_CACHE[key] = (
            jnp.asarray(apool, dtype=jnp.bfloat16),
            jnp.asarray(eh, dtype=jnp.bfloat16),
            jnp.asarray(ew, dtype=jnp.bfloat16),
            jnp.asarray(colscale, dtype=jnp.float32),
        )
    return _CONST_CACHE[key]


def _pick_batch_block(B):
    """Largest divisor of B that still leaves >= 2 grid steps (v7x: 2 TCs)."""
    if B <= 1:
        return 1
    target = max(1, B // 2)
    for bb in range(target, 0, -1):
        if B % bb == 0:
            return bb
    return 1


# ---------------------------------------------------------------------------
# Kernel
# ---------------------------------------------------------------------------
def _coordatt_kernel(x_ref, apool_ref, cs_ref, w1_ref, b1_ref, whw_ref, bhw_ref,
                     eh_ref, ew_ref, o_ref):
    # x_ref  : (B_blk, C, N)   block of batch elements, channels x flat spatial
    # apool  : (N, H+W) bf16   0/1 coordinate-pooling matrix
    # cs     : (1, H+W) f32    per-column 1/W , 1/H mean scales
    # w1/b1  : (mip, C), (mip, 1) f32   conv1 with BatchNorm folded (eval mode)
    # whw/bhw: (2C, mip), (2C, 1) f32   conv_h and conv_w stacked on out-chans
    # eh/ew  : (H+W, N) bf16   0/1 expansion matrices (C,H)->(C,N), (C,W)->(C,N)
    # o_ref  : (B_blk, C, N)
    Bb, C, N = x_ref.shape
    S = apool_ref.shape[1]                               # H + W

    x = x_ref[...].reshape(Bb * C, N)                    # fold batch into MXU M
    xb = x.astype(jnp.bfloat16)

    # Coordinate average pooling along both axes: one bf16 MXU matmul, then the
    # exact f32 per-column mean scale.
    y = jnp.dot(xb, apool_ref[...], preferred_element_type=jnp.float32)   # (Bb*C, S)
    y = y * cs_ref[...]

    w1 = w1_ref[...]
    b1 = b1_ref[...]
    whw = whw_ref[...]
    bhw = bhw_ref[...]

    # conv1(+BN) / h_swish / stacked conv_h|conv_w per batch element (the
    # channel contraction can't fold into the batched M dim; these matmuls are
    # tiny so a short static loop is fine).
    gates_h, gates_w = [], []
    for b in range(Bb):
        yb = y[b * C:(b + 1) * C]                                          # (C, S)
        z = jnp.dot(w1, yb, preferred_element_type=jnp.float32) + b1       # (mip, S)
        z = z * (jnp.clip(z + 3.0, 0.0, 6.0) * (1.0 / 6.0))                # h_swish
        a = jnp.dot(whw, z, preferred_element_type=jnp.float32) + bhw      # (2C, S)
        a = 0.5 * (jnp.tanh(0.5 * a) + 1.0)                                # sigmoid (EUP tanh)
        gates_h.append(a[:C])
        gates_w.append(a[C:])

    azh = (jnp.concatenate(gates_h, axis=0) if Bb > 1 else gates_h[0]).astype(jnp.bfloat16)
    azw = (jnp.concatenate(gates_w, axis=0) if Bb > 1 else gates_w[0]).astype(jnp.bfloat16)

    # Expand a_h (C,H) and a_w (C,W) to lane-dense (C,N) via 0/1 bf16 matmuls.
    a_h = jnp.dot(azh, eh_ref[...], preferred_element_type=jnp.float32)    # (Bb*C, N)
    a_w = jnp.dot(azw, ew_ref[...], preferred_element_type=jnp.float32)    # (Bb*C, N)

    o_ref[...] = (x * a_h * a_w).reshape(Bb, C, N)


# ---------------------------------------------------------------------------
# Wrapper
# ---------------------------------------------------------------------------
def coordatt_forward(x, w1, b1, bn_gamma, bn_beta, bn_mean, bn_var,
                     wh, bh, ww, bw, eps=1e-5):
    """x: (B, C, H, W) f32 NCHW.  w1: (mip, C), wh/ww: (C, mip).  Returns (B, C, H, W)."""
    B, C, H, W = x.shape
    mip = w1.shape[0]
    oup = wh.shape[0]
    assert oup == C, "identity * a_w * a_h requires oup == inp"
    N = H * W
    S = H + W

    x_flat = x.reshape(B, C, N)

    # Fold BatchNorm (eval mode) into conv1 (kept f32).
    scale = bn_gamma / jnp.sqrt(bn_var + eps)                                # (mip,)
    w1f = (w1 * scale[:, None]).astype(jnp.float32)                          # (mip, C)
    b1f = ((b1 - bn_mean) * scale + bn_beta)[:, None].astype(jnp.float32)    # (mip, 1)

    # Stack conv_h / conv_w into one projection.
    whw = jnp.concatenate([wh, ww], axis=0).astype(jnp.float32)              # (2C, mip)
    bhw = jnp.concatenate([bh, bw], axis=0)[:, None].astype(jnp.float32)     # (2C, 1)

    apool, eh, ew, colscale = _coord_constants(H, W)

    B_blk = _pick_batch_block(B)
    nsteps = B // B_blk

    # Explicit VMEM budget (default scoped limit binds before physical VMEM).
    blk_bytes = B_blk * C * N * 4
    const_bytes = (N * S + 2 * S * N) * 2 + S * 4                            # bf16 consts + colscale
    wt_bytes = (mip * C + mip + 2 * C * mip + 2 * C) * 4
    vmem_est = 2 * (2 * blk_bytes + const_bytes + wt_bytes)                  # double-buffered
    vmem_limit = int(min(max(vmem_est + (8 << 20), 32 << 20), 64 << 20))

    out = pl.pallas_call(
        _coordatt_kernel,
        out_shape=jax.ShapeDtypeStruct((B, C, N), jnp.float32),
        grid_spec=pltpu.PrefetchScalarGridSpec(
            num_scalar_prefetch=0,
            grid=(nsteps,),
            in_specs=[
                pl.BlockSpec((B_blk, C, N), lambda b: (b, 0, 0)),   # x
                pl.BlockSpec((N, S), lambda b: (0, 0)),             # apool (bf16, 0/1)
                pl.BlockSpec((1, S), lambda b: (0, 0)),             # colscale (f32)
                pl.BlockSpec((mip, C), lambda b: (0, 0)),           # w1 (BN folded)
                pl.BlockSpec((mip, 1), lambda b: (0, 0)),           # b1 (BN folded)
                pl.BlockSpec((2 * C, mip), lambda b: (0, 0)),       # [wh; ww]
                pl.BlockSpec((2 * C, 1), lambda b: (0, 0)),         # [bh; bw]
                pl.BlockSpec((S, N), lambda b: (0, 0)),             # eh (bf16, 0/1)
                pl.BlockSpec((S, N), lambda b: (0, 0)),             # ew (bf16, 0/1)
            ],
            out_specs=pl.BlockSpec((B_blk, C, N), lambda b: (b, 0, 0)),
        ),
        compiler_params=pltpu.CompilerParams(
            dimension_semantics=("parallel",),
            vmem_limit_bytes=vmem_limit),
    )(x_flat, apool, colscale, w1f, b1f, whw, bhw, eh, ew)

    return out.reshape(B, C, H, W)


# ---------------------------------------------------------------------------
# Pure-JAX reference (replicates the PyTorch forward, eval-mode BN)
# ---------------------------------------------------------------------------
def coordatt_reference(x, w1, b1, bn_gamma, bn_beta, bn_mean, bn_var,
                       wh, bh, ww, bw, eps=1e-5):
    B, C, H, W = x.shape
    x_h = jnp.mean(x, axis=3, keepdims=True)                                 # (B,C,H,1)
    x_w = jnp.transpose(jnp.mean(x, axis=2, keepdims=True), (0, 1, 3, 2))    # (B,C,W,1)
    y = jnp.concatenate([x_h, x_w], axis=2)                                  # (B,C,H+W,1)
    y = jnp.einsum("oc,bcsk->bosk", w1, y) + b1[None, :, None, None]
    y = ((y - bn_mean[None, :, None, None])
         * (bn_gamma / jnp.sqrt(bn_var + eps))[None, :, None, None]
         + bn_beta[None, :, None, None])
    y = y * jnp.clip(y + 3.0, 0.0, 6.0) / 6.0                                # h_swish
    y_h = y[:, :, :H, :]                                                     # (B,mip,H,1)
    y_w = jnp.transpose(y[:, :, H:, :], (0, 1, 3, 2))                        # (B,mip,1,W)
    a_h = jax.nn.sigmoid(jnp.einsum("oc,bcsk->bosk", wh, y_h) + bh[None, :, None, None])
    a_w = jax.nn.sigmoid(jnp.einsum("oc,bcsk->bosk", ww, y_w) + bw[None, :, None, None])
    return x * a_w * a_h


if __name__ == "__main__":
    # CoordAtt(inp=32, oup=32, reduction=32) -> mip = max(8, 32//32) = 8.
    B, C, H, W = 2, 32, 16, 16
    reduction = 32
    mip = max(8, C // reduction)

    key = jax.random.PRNGKey(0)
    ks = jax.random.split(key, 11)
    x = jax.random.normal(ks[0], (B, C, H, W), dtype=jnp.float32)

    w1 = 0.3 * jax.random.normal(ks[1], (mip, C), dtype=jnp.float32)
    b1 = 0.1 * jax.random.normal(ks[2], (mip,), dtype=jnp.float32)
    bn_gamma = 1.0 + 0.1 * jax.random.normal(ks[3], (mip,), dtype=jnp.float32)
    bn_beta = 0.1 * jax.random.normal(ks[4], (mip,), dtype=jnp.float32)
    bn_mean = 0.1 * jax.random.normal(ks[5], (mip,), dtype=jnp.float32)
    bn_var = jnp.abs(jax.random.normal(ks[6], (mip,), dtype=jnp.float32)) + 0.5
    wh = 0.3 * jax.random.normal(ks[7], (C, mip), dtype=jnp.float32)
    bh = 0.1 * jax.random.normal(ks[8], (C,), dtype=jnp.float32)
    ww = 0.3 * jax.random.normal(ks[9], (C, mip), dtype=jnp.float32)
    bw = 0.1 * jax.random.normal(ks[10], (C,), dtype=jnp.float32)

    y = coordatt_forward(x, w1, b1, bn_gamma, bn_beta, bn_mean, bn_var, wh, bh, ww, bw)
    y = jax.block_until_ready(y)

    y_ref = jax.block_until_ready(
        coordatt_reference(x, w1, b1, bn_gamma, bn_beta, bn_mean, bn_var, wh, bh, ww, bw))

    assert y.shape == (B, C, H, W)
    # bf16 operands on the pooling / expansion matmuls introduce ~0.2-0.5% rel
    # error vs the f32 reference; gate with a 2e-2 tolerance.
    assert jnp.allclose(y, y_ref, rtol=2e-2, atol=2e-2), "mismatch vs reference"

    print("KERNEL_OK")
</pallas_src>

<mosaic_0001>
module attributes {stable_mosaic.version = 11 : i64} {
  func.func @_coordatt_kernel(%arg0: i32, %arg1: memref<1x32x256xf32, #tpu.memory_space<vmem>>, %arg2: memref<256x32xbf16, #tpu.memory_space<vmem>>, %arg3: memref<1x32xf32, #tpu.memory_space<vmem>>, %arg4: memref<8x32xf32, #tpu.memory_space<vmem>>, %arg5: memref<8x1xf32, #tpu.memory_space<vmem>>, %arg6: memref<64x8xf32, #tpu.memory_space<vmem>>, %arg7: memref<64x1xf32, #tpu.memory_space<vmem>>, %arg8: memref<32x256xbf16, #tpu.memory_space<vmem>>, %arg9: memref<32x256xbf16, #tpu.memory_space<vmem>>, %arg10: memref<1x32x256xf32, #tpu.memory_space<vmem>>) attributes {dimension_semantics = [#tpu.dimension_semantics<parallel>], iteration_bounds = array<i64: 2>, scalar_prefetch = 0 : i64, scratch_operands = 0 : i64, tpu.core_type = #tpu.core_type<tc>, window_params = [{transform_indices = @transform_0, window_bounds = array<i64: 1, 32, 256>}, {pipeline_mode = #tpu.pipeline_mode<synchronous>, transform_indices = @transform_1, window_bounds = array<i64: 256, 32>}, {pipeline_mode = #tpu.pipeline_mode<synchronous>, transform_indices = @transform_2, window_bounds = array<i64: 1, 32>}, {pipeline_mode = #tpu.pipeline_mode<synchronous>, transform_indices = @transform_3, window_bounds = array<i64: 8, 32>}, {pipeline_mode = #tpu.pipeline_mode<synchronous>, transform_indices = @transform_4, window_bounds = array<i64: 8, 1>}, {pipeline_mode = #tpu.pipeline_mode<synchronous>, transform_indices = @transform_5, window_bounds = array<i64: 64, 8>}, {pipeline_mode = #tpu.pipeline_mode<synchronous>, transform_indices = @transform_6, window_bounds = array<i64: 64, 1>}, {pipeline_mode = #tpu.pipeline_mode<synchronous>, transform_indices = @transform_7, window_bounds = array<i64: 32, 256>}, {pipeline_mode = #tpu.pipeline_mode<synchronous>, transform_indices = @transform_8, window_bounds = array<i64: 32, 256>}, {transform_indices = @transform_9, window_bounds = array<i64: 1, 32, 256>}]} {
    %c0 = arith.constant 0 : index
    %c0_0 = arith.constant 0 : index
    %c0_1 = arith.constant 0 : index
    %0 = vector.load %arg1[%c0, %c0_0, %c0_1] : memref<1x32x256xf32, #tpu.memory_space<vmem>>, vector<1x32x256xf32>
    %1 = vector.shape_cast %0 : vector<1x32x256xf32> to vector<32x256xf32>
    %2 = arith.truncf %1 : vector<32x256xf32> to vector<32x256xbf16>
    %c0_2 = arith.constant 0 : index
    %c0_3 = arith.constant 0 : index
    %3 = vector.load %arg2[%c0_2, %c0_3] : memref<256x32xbf16, #tpu.memory_space<vmem>>, vector<256x32xbf16>
    %cst = arith.constant dense<0.000000e+00> : vector<32x32xf32>
    %4 = tpu.matmul %2, %3, %cst {dimension_numbers = #tpu.dot_dimension_numbers<[1], [0], [0], [1], [0, 0, 1, 1], [], []>} : vector<32x256xbf16>, vector<256x32xbf16>, vector<32x32xf32> -> vector<32x32xf32>
    %c0_4 = arith.constant 0 : index
    %c0_5 = arith.constant 0 : index
    %5 = vector.load %arg3[%c0_4, %c0_5] : memref<1x32xf32, #tpu.memory_space<vmem>>, vector<1x32xf32>
    %6 = vector.broadcast %5 : vector<1x32xf32> to vector<32x32xf32>
    %7 = arith.mulf %4, %6 : vector<32x32xf32>
    %c0_6 = arith.constant 0 : index
    %c0_7 = arith.constant 0 : index
    %8 = vector.load %arg4[%c0_6, %c0_7] : memref<8x32xf32, #tpu.memory_space<vmem>>, vector<8x32xf32>
    %c0_8 = arith.constant 0 : index
    %c0_9 = arith.constant 0 : index
    %9 = vector.load %arg5[%c0_8, %c0_9] : memref<8x1xf32, #tpu.memory_space<vmem>>, vector<8x1xf32>
    %c0_10 = arith.constant 0 : index
    %c0_11 = arith.constant 0 : index
    %10 = vector.load %arg6[%c0_10, %c0_11] : memref<64x8xf32, #tpu.memory_space<vmem>>, vector<64x8xf32>
    %c0_12 = arith.constant 0 : index
    %c0_13 = arith.constant 0 : index
    %11 = vector.load %arg7[%c0_12, %c0_13] : memref<64x1xf32, #tpu.memory_space<vmem>>, vector<64x1xf32>
    %cst_14 = arith.constant dense<0.000000e+00> : vector<8x32xf32>
    %12 = tpu.matmul %8, %7, %cst_14 {dimension_numbers = #tpu.dot_dimension_numbers<[1], [0], [0], [1], [0, 0, 1, 1], [], []>} : vector<8x32xf32>, vector<32x32xf32>, vector<8x32xf32> -> vector<8x32xf32>
    %13 = vector.broadcast %9 : vector<8x1xf32> to vector<8x32xf32>
    %14 = arith.addf %12, %13 : vector<8x32xf32>
    %cst_15 = arith.constant 3.000000e+00 : f32
    %15 = vector.broadcast %cst_15 : f32 to vector<8x32xf32>
    %16 = arith.addf %14, %15 : vector<8x32xf32>
    %cst_16 = arith.constant 0.000000e+00 : f32
    %cst_17 = arith.constant 6.000000e+00 : f32
    %17 = vector.broadcast %cst_16 : f32 to vector<8x32xf32>
    %18 = arith.maximumf %17, %16 : vector<8x32xf32>
    %19 = vector.broadcast %cst_17 : f32 to vector<8x32xf32>
    %20 = arith.minimumf %19, %18 : vector<8x32xf32>
    %cst_18 = arith.constant 0.166666672 : f32
    %21 = vector.broadcast %cst_18 : f32 to vector<8x32xf32>
    %22 = arith.mulf %20, %21 : vector<8x32xf32>
    %23 = arith.mulf %14, %22 : vector<8x32xf32>
    %cst_19 = arith.constant dense<0.000000e+00> : vector<64x32xf32>
    %24 = tpu.matmul %10, %23, %cst_19 {dimension_numbers = #tpu.dot_dimension_numbers<[1], [0], [0], [1], [0, 0, 1, 1], [], []>} : vector<64x8xf32>, vector<8x32xf32>, vector<64x32xf32> -> vector<64x32xf32>
    %25 = vector.broadcast %11 : vector<64x1xf32> to vector<64x32xf32>
    %26 = arith.addf %24, %25 : vector<64x32xf32>
    %cst_20 = arith.constant 5.000000e-01 : f32
    %27 = vector.broadcast %cst_20 : f32 to vector<64x32xf32>
    %28 = arith.mulf %27, %26 : vector<64x32xf32>
    %29 = math.tanh %28 : vector<64x32xf32>
    %cst_21 = arith.constant 1.000000e+00 : f32
    %30 = vector.broadcast %cst_21 : f32 to vector<64x32xf32>
    %31 = arith.addf %29, %30 : vector<64x32xf32>
    %cst_22 = arith.constant 5.000000e-01 : f32
    %32 = vector.broadcast %cst_22 : f32 to vector<64x32xf32>
    %33 = arith.mulf %32, %31 : vector<64x32xf32>
    %34 = vector.extract_strided_slice %33 {offsets = [0, 0], sizes = [32, 32], strides = [1, 1]} : vector<64x32xf32> to vector<32x32xf32>
    %35 = vector.extract_strided_slice %33 {offsets = [32, 0], sizes = [32, 32], strides = [1, 1]} : vector<64x32xf32> to vector<32x32xf32>
    %36 = arith.truncf %34 : vector<32x32xf32> to vector<32x32xbf16>
    %37 = arith.truncf %35 : vector<32x32xf32> to vector<32x32xbf16>
    %c0_23 = arith.constant 0 : index
    %c0_24 = arith.constant 0 : index
    %38 = vector.load %arg8[%c0_23, %c0_24] : memref<32x256xbf16, #tpu.memory_space<vmem>>, vector<32x256xbf16>
    %cst_25 = arith.constant dense<0.000000e+00> : vector<32x256xf32>
    %39 = tpu.matmul %36, %38, %cst_25 {dimension_numbers = #tpu.dot_dimension_numbers<[1], [0], [0], [1], [0, 0, 1, 1], [], []>} : vector<32x32xbf16>, vector<32x256xbf16>, vector<32x256xf32> -> vector<32x256xf32>
    %c0_26 = arith.constant 0 : index
    %c0_27 = arith.constant 0 : index
    %40 = vector.load %arg9[%c0_26, %c0_27] : memref<32x256xbf16, #tpu.memory_space<vmem>>, vector<32x256xbf16>
    %cst_28 = arith.constant dense<0.000000e+00> : vector<32x256xf32>
    %41 = tpu.matmul %37, %40, %cst_28 {dimension_numbers = #tpu.dot_dimension_numbers<[1], [0], [0], [1], [0, 0, 1, 1], [], []>} : vector<32x32xbf16>, vector<32x256xbf16>, vector<32x256xf32> -> vector<32x256xf32>
    %42 = arith.mulf %1, %39 : vector<32x256xf32>
    %43 = arith.mulf %42, %41 : vector<32x256xf32>
    %44 = vector.shape_cast %43 : vector<32x256xf32> to vector<1x32x256xf32>
    %c0_29 = arith.constant 0 : index
    %c0_30 = arith.constant 0 : index
    %c0_31 = arith.constant 0 : index
    %45 = vector.load %arg10[%c0_29, %c0_30, %c0_31] : memref<1x32x256xf32, #tpu.memory_space<vmem>>, vector<1x32x256xf32>
    tpu.vector_store %arg10[%c0_29, %c0_30, %c0_31], %44 {strides = array<i32>} : memref<1x32x256xf32, #tpu.memory_space<vmem>>, vector<1x32x256xf32>,
    return
  }
  func.func @transform_0(%arg0: i32) -> (i32, i32, i32) {
    %c0_i32 = arith.constant 0 : i32
    %c0_i32_0 = arith.constant 0 : i32
    %c0_i32_1 = arith.constant 0 : i32
    return %arg0, %c0_i32, %c0_i32_0 : i32, i32, i32
  }
  func.func @transform_1(%arg0: i32) -> (i32, i32) {
    %c0_i32 = arith.constant 0 : i32
    %c0_i32_0 = arith.constant 0 : i32
    %c0_i32_1 = arith.constant 0 : i32
    return %c0_i32, %c0_i32_0 : i32, i32
  }
  func.func @transform_2(%arg0: i32) -> (i32, i32) {
    %c0_i32 = arith.constant 0 : i32
    %c0_i32_0 = arith.constant 0 : i32
    %c0_i32_1 = arith.constant 0 : i32
    return %c0_i32, %c0_i32_0 : i32, i32
  }
  func.func @transform_3(%arg0: i32) -> (i32, i32) {
    %c0_i32 = arith.constant 0 : i32
    %c0_i32_0 = arith.constant 0 : i32
    %c0_i32_1 = arith.constant 0 : i32
    return %c0_i32, %c0_i32_0 : i32, i32
  }
  func.func @transform_4(%arg0: i32) -> (i32, i32) {
    %c0_i32 = arith.constant 0 : i32
    %c0_i32_0 = arith.constant 0 : i32
    %c0_i32_1 = arith.constant 0 : i32
    return %c0_i32, %c0_i32_0 : i32, i32
  }
  func.func @transform_5(%arg0: i32) -> (i32, i32) {
    %c0_i32 = arith.constant 0 : i32
    %c0_i32_0 = arith.constant 0 : i32
    %c0_i32_1 = arith.constant 0 : i32
    return %c0_i32, %c0_i32_0 : i32, i32
  }
  func.func @transform_6(%arg0: i32) -> (i32, i32) {
    %c0_i32 = arith.constant 0 : i32
    %c0_i32_0 = arith.constant 0 : i32
    %c0_i32_1 = arith.constant 0 : i32
    return %c0_i32, %c0_i32_0 : i32, i32
  }
  func.func @transform_7(%arg0: i32) -> (i32, i32) {
    %c0_i32 = arith.constant 0 : i32
    %c0_i32_0 = arith.constant 0 : i32
    %c0_i32_1 = arith.constant 0 : i32
    return %c0_i32, %c0_i32_0 : i32, i32
  }
  func.func @transform_8(%arg0: i32) -> (i32, i32) {
    %c0_i32 = arith.constant 0 : i32
    %c0_i32_0 = arith.constant 0 : i32
    %c0_i32_1 = arith.constant 0 : i32
    return %c0_i32, %c0_i32_0 : i32, i32
  }
  func.func @transform_9(%arg0: i32) -> (i32, i32, i32) {
    %c0_i32 = arith.constant 0 : i32
    %c0_i32_0 = arith.constant 0 : i32
    %c0_i32_1 = arith.constant 0 : i32
    return %arg0, %c0_i32, %c0_i32_0 : i32, i32, i32
  }
}

</mosaic_0001>

<bundles_post_ra>
// kernel: tpu_custom_call.1
= control target key start
LH: loop header
LB: loop body
LE: loop exit
PB: predicated region body
PF: predicated region fallthrough
CT: control target
= control target key end

     0   :  { %14 = vsyncpa [#allocation3], 0  ;;  %s1584_s0 = inlined_call_operand.vmem [shape: f32[2,32,256], index: 0, kind: input, shape index: {}]   ;;  %s1585_s1 = inlined_call_operand.vmem [shape: bf16[256,32], index: 1, kind: input, shape index: {}]   ;;  %s1586_s2 = inlined_call_operand.vmem [shape: f32[1,32], index: 2, kind: input, shape index: {}]   ;;  %s1587_s3 = inlined_call_operand.vmem [shape: f32[8,32], index: 3, kind: input, shape index: {}]   ;;  %s1588_s4 = inlined_call_operand.vmem [shape: f32[8,1], index: 4, kind: input, shape index: {}]   ;;  %s1589_s5 = inlined_call_operand.vmem [shape: f32[64,8], index: 5, kind: input, shape index: {}]   ;;  %s1590_s6 = inlined_call_operand.vmem [shape: f32[64,1], index: 6, kind: input, shape index: {}]   ;;  %s1591_s7 = inlined_call_operand.vmem [shape: bf16[32,256], index: 7, kind: input, shape index: {}]   ;;  %s1592_s8 = inlined_call_operand.vmem [shape: bf16[32,256], index: 8, kind: input, shape index: {}]   ;;  %s1593_s9 = inlined_call_operand.hbm [shape: f32[2,32,256], index: 9, kind: output, shape index: {}]  }
   0x1   :  { %16 = vsyncpa [#allocation3 + $0x1], 0  ;;  %s1282_s30 = smov 0   ;;  %s1284_s10 = smov 0  }
   0x2   :  { %s1286_s11 = smov 0   ;;  %s1288_s12 = smov 0  }
   0x3 LB: > { %s1303_s13 = sadd.s32 4294967295, %s1227_s12   ;;  %s950_s14 = sadd.s32 4294967294, %s1227_s12   ;;  %s1227_s12 = sphi %s1288_s12, %s1601_s12   ;;  %s1223_s11 = sphi %s1286_s11, %s1600_s11   ;;  %s1219_s10 = sphi %s1284_s10, %s1599_s10   ;;  %s1215_s30 = sphi %s1282_s30, %s1598_s30  }
   0x4   : > { %s1307_s15 = sadd.s32 1, %s1227_s12   ;;  %s223_s16 = sadd.s32 1, %s1223_s11 }
   0x5   : > { %s220_s17 = ssub.s32 %s1227_s12, %s1307_s15  ;;  %p233_p0 = scmp.ne.s32.totalorder %s1223_s11, %s1219_s10 }
   0x6   : > { %p221_p1 = scmp.eq.s32.totalorder %s220_s17, 0  ;;  %p234_p2 = scmp.eq.s32.totalorder %s1303_s13, 1 }
   0x7   : > { %p239_p3 = scmp.ne.s32.totalorder %s1219_s10, %s1215_s30  ;;  %p240_p4 = scmp.eq.s32.totalorder %s950_s14, 1 }
   0x8   : > { %s1318_s18 = scalar_select %p221_p1, %s1223_s11, %s223_s16  }
   0x9   : > { %p1320_p5 = por %p234_p2, %p233_p0  ;;  %p1324_p6 = por %p240_p4, %p239_p3 }
   0xa   : > { %1594 = sst [smem:[#allocation5_spill]] %s1318_s18  ;;  %p953_p7 = scmp.ge.s32.totalorder %s1227_s12, 1 }
   0xb   : > { %p290_p8 = scmp.lt.s32.totalorder %s1227_s12, 3 }
   0xd   : > { %p291_p9 = pnand %p953_p7, %p290_p8 }
   0xe   : > { %p326_p10 = scmp.lt.s32.totalorder (!%p291_p9), %s1303_s13, 1  ;;  %s323_s25 = sand.u32 (!%p291_p9), 1, %s1219_s10  }
   0xf   : > { %294 = sbr.rel (%p291_p9) target bundleno = 712 (0x2c8), region = 56  ;;  %s954_s26 = sshll.u32 (!%p291_p9), %s323_s25, 6 }
  0x10   : > { %s1533_s27 = scalar_lea.vmem (!%p291_p9), [#allocation2], %s954_s26  ;;  %s1100_s28 = sshll.u32 (!%p291_p9), %s1303_s13, 6 }
  0x11   : > { %s884_s17 = scalar_lea.hbm (!%p291_p9), %s1593_s9, %s1100_s28  ;;  %s1185_s26 = scalar_lea.hbm (!%p291_p9), %s1593_s9, 128 }
  0x12   : > { %s887_s18 = sshll.u32 (!%p291_p9), %s884_s17, 4  ;;  %s888_s18 = int_to_ptr.hbm [resolvable:$true] %s887_s18 }
  0x13   : > { %s1179_s21 = sshra.s32 (!%p291_p9), %s888_s18, 4  ;;  %s1180_s21 = int_to_ptr.hbm [resolvable:$true] %s1179_s21 }
  0x14   : > { %v1083_v0 = vld [vmem:[%s1585_s1 + $0x38] sm:$0xff]  ;;  %v1082_v2 = vld [vmem:[%s1585_s1 + $0x30] sm:$0xff]  ;;  %v1081_v4 = vld [vmem:[%s1585_s1 + $0x28] sm:$0xff]  ;;  %s327_s29 = scalar_select %p326_p10, %s1303_s13, 1  ;;  %v1229_v30 = vmov 0   ;;  %vm541_vm0 = vcmask 261120  }
  0x15   : > { %v1091_v1 = vld [vmem:[%s1585_s1 + $0x78] sm:$0xff]  ;;  %472 = vmatpush.bf16.msra.mxu0 %v1083_v0  ;;  %v1090_v3 = vld [vmem:[%s1585_s1 + $0x70] sm:$0xff]  ;;  %v1089_v5 = vld [vmem:[%s1585_s1 + $0x68] sm:$0xff]  ;;  %1145 = vset.pattern.permute.xlu0 %v1229_v30  ;;  %vm610_vm1 = vcmask 64512   ;;  %s873_s13 = scalar_lea.sflag [#allocation3], %s323_s25  ;;  %p1186_p0 = scmp.lt.s32.totalorder %s1180_s21, %s1593_s9 }
  0x16   : > { %491 = vmatpush.bf16.msra.mxu1 %v1091_v1  ;;  %v1080_v6 = vld [vmem:[%s1585_s1 + $0x20] sm:$0xff]  ;;  %v1079_v8 = vld [vmem:[%s1585_s1 + $0x18] sm:$0xff]  ;;  %v1078_v10 = vld [vmem:[%s1585_s1 + $0x10] sm:$0xff]  ;;  %s1075_s22 = sshll.u32 %s327_s29, 6  ;;  %1146 = vset.pattern.permute.xlu1 %v1229_v30  ;;  %s885_s29 = sshll.u32 %s1533_s27, 4  ;;  %s886_s29 = int_to_ptr.vmem [resolvable:$true] %s885_s29 }
  0x17   : > { %v1088_v7 = vld [vmem:[%s1585_s1 + $0x60] sm:$0xff]  ;;  %v1087_v9 = vld [vmem:[%s1585_s1 + $0x58] sm:$0xff]  ;;  %v1086_v11 = vld [vmem:[%s1585_s1 + $0x50] sm:$0xff]  ;;  %s330_s14 = scalar_lea.vmem %s1584_s0, %s1075_s22  ;;  %1147 = vset.pattern.permute.xlu2 %v1229_v30  ;;  %s1181_s22 = scalar_lea.hbm %s1180_s21, 64 }
  0x18   : > { %v1077_v12 = vld [vmem:[%s1585_s1 + $0x8] sm:$0xff]  ;;  %v1076_v14 = vld [vmem:[%s1585_s1] sm:$0xff]  ;;  %v1385_v17 = vld [vmem:[%s330_s14 + $0x10] sm:$0xff]  ;;  %p1182_p11 = scmp.ne.s32.totalorder %s1180_s21, %s1181_s22  ;;  %p1187_p1 = scmp.lt.s32.totalorder %s1185_s26, %s1181_s22 }
  0x19   : > { %473 = vmatpush.bf16.msra.mxu0 %v1082_v2  ;;  %v1085_v13 = vld [vmem:[%s1585_s1 + $0x48] sm:$0xff]  ;;  %v1084_v15 = vld [vmem:[%s1585_s1 + $0x40] sm:$0xff]  ;;  %v1389_v19 = vld [vmem:[%s330_s14 + $0x18] sm:$0xff] }
  0x1a   : > { %492 = vmatpush.bf16.msra.mxu1 %v1090_v3  ;;  %v1383_v16 = vld [vmem:[%s330_s14] sm:$0xff]  ;;  %v1387_v18 = vld [vmem:[%s330_s14 + $0x8] sm:$0xff]  ;;  %v1397_v23 = vld [vmem:[%s330_s14 + $0x30] sm:$0xff]  ;;  %p1183_p12 = pnand %p1182_p11, %p1320_p5  ;;  %p1188_p2 = por %p1187_p1, %p1186_p0 }
  0x1b   : > { %v340_v20 = vpack.c.bf16 %v1385_v17, %v1383_v16  ;;  %v341_v21 = vpack.c.bf16 %v1389_v19, %v1387_v18  ;;  %v1395_v22 = vld [vmem:[%s330_s14 + $0x20] sm:$0xff]  ;;  %v1399_v24 = vld [vmem:[%s330_s14 + $0x28] sm:$0xff]  ;;  %v1401_v25 = vld [vmem:[%s330_s14 + $0x38] sm:$0xff] }
  0x1c   : > { %v342_v26 = vpack.c.bf16 %v1397_v23, %v1395_v22  ;;  %v343_v27 = vpack.c.bf16 %v1401_v25, %v1399_v24  ;;  %v519_v31 = vld [vmem:[%s1588_s4] sm:$0xff]  ;;  %v533_v37 = vld [vmem:[%s1590_s6 + $0x28] sm:$0xff]  ;;  %v530_v51 = vld [vmem:[%s1590_s6 + $0x10] sm:$0xff]  ;;  %p1184_p13 = pneg %p1183_p12 }
  0x1d   : > { %474 = vmatpush.bf16.msra.mxu0 %v1081_v4  ;;  %538 = vperm.xlu0 %1145, %v519_v31   ;;  %v528_v34 = vld [vmem:[%s1590_s6] sm:$0xff]  ;;  %v529_v50 = vld [vmem:[%s1590_s6 + $0x8] sm:$0xff]  ;;  %v534_v57 = vld [vmem:[%s1590_s6 + $0x30] sm:$0xff] }
  0x1e   : > { %493 = vmatpush.bf16.msra.mxu1 %v1089_v5  ;;  %v1148_v42 = vld [vmem:[%s1586_s2] ss:$0 sm:$0xff]  ;;  %577 = vperm.xlu1 %1146, %v529_v50   ;;  %v521_v62 = vld [vmem:[%s1589_s5 + $0x8] sm:$0xff]  ;;  %v522_v63 = vld [vmem:[%s1589_s5 + $0x10] sm:$0xff]  ;;  %p1189_p3 = pnand %p1188_p2, %p1184_p13 }
  0x1f   : > { %v518_v49 = vld [vmem:[%s1587_s3] sm:$0xff]  ;;  %v531_v0 = vld [vmem:[%s1590_s6 + $0x18] sm:$0xff]  ;;  %v525_v5 = vld [vmem:[%s1589_s5 + $0x28] sm:$0xff] }
  0x20   : > { %v520_v61 = vld [vmem:[%s1589_s5] sm:$0xff]  ;;  %587 = vperm.xlu2 %1147, %v531_v0   ;;  %v523_v1 = vld [vmem:[%s1589_s5 + $0x18] sm:$0xff]  ;;  %v1094_v30 = vld [vmem:[%s1591_s7 + $0x14] sm:$0xf] }
  0x21   : > { %475 = vmatpush.bf16.msra.mxu0 %v1080_v6  ;;  %v532_v2 = vld [vmem:[%s1590_s6 + $0x20] sm:$0xff]  ;;  %v535_v4 = vld [vmem:[%s1590_s6 + $0x38] sm:$0xff]  ;;  %v526_v6 = vld [vmem:[%s1589_s5 + $0x30] sm:$0xff] }
  0x22   : > { %494 = vmatpush.bf16.msra.mxu1 %v1088_v7  ;;  %v524_v3 = vld [vmem:[%s1589_s5 + $0x20] sm:$0xff]  ;;  %v527_v7 = vld [vmem:[%s1589_s5 + $0x38] sm:$0xff] }
  0x23   : > { %v1042_v31 = vld [vmem:[%s1591_s7 + $0x18] sm:$0xf0]  ;;  %v1052_v50 = vld [vmem:[%s1592_s8] sm:$0xf] }
  0x25   : > { %476 = vmatpush.bf16.msra.mxu0 %v1079_v8  ;;  %572 = vperm.xlu0 %1145, %v528_v34   ;;  %v1040_v8 = vld [vmem:[%s1591_s7 + $0x10] sm:$0xf] }
  0x26   : > { %495 = vmatpush.bf16.msra.mxu1 %v1087_v9  ;;  %582 = vperm.xlu1 %1146, %v530_v51   ;;  %v1095_v9 = vld [vmem:[%s1591_s7 + $0x14] sm:$0xf0]  ;;  %v1097_v51 = vld [vmem:[%s1592_s8 + $0x4] sm:$0xf0] }
  0x28   : > { %592 = vperm.xlu2 %1147, %v532_v2  }
  0x29   : > { %477 = vmatpush.bf16.msra.mxu0 %v1078_v10  ;;  %v1041_v10 = vor.u32 %v1095_v9, %v1040_v8 }
  0x2a   : > { %496 = vmatpush.bf16.msra.mxu1 %v1086_v11  ;;  %v1032_v11 = vld [vmem:[%s1591_s7] sm:$0xf] }
  0x2d   : > { %478 = vmatpush.bf16.msra.mxu0 %v1077_v12  ;;  %597 = vperm.xlu0 %1145, %v533_v37   ;;  %v1093_v12 = vld [vmem:[%s1591_s7 + $0x4] sm:$0xf0]  ;;  %v1062_v37 = vld [vmem:[%s1592_s8 + $0x18] sm:$0xf0] }
  0x2e   : > { %497 = vmatpush.bf16.msra.mxu1 %v1085_v13  ;;  %602 = vperm.xlu1 %1146, %v534_v57   ;;  %v1033_v13 = vor.u32 %v1093_v12, %v1032_v11  ;;  %v1054_v57 = vld [vmem:[%s1592_s8 + $0x8] sm:$0xf0] }
  0x30   : > { %607 = vperm.xlu2 %1147, %v535_v4  }
  0x31   : > { %479 = vmatpush.bf16.msra.mxu0 %v1076_v14  ;;  %v1060_v14 = vld [vmem:[%s1592_s8 + $0x10] sm:$0xf] }
  0x32   : > { %498 = vmatpush.bf16.msra.mxu1 %v1084_v15  ;;  %v1099_v15 = vld [vmem:[%s1592_s8 + $0x14] sm:$0xf0] }
  0x34   : > { %480 = vmatmul.bf16.vlgmr.msra.gmra.mxu0 %v340_v20  ;;  %v1061_v20 = vor.u32 %v1099_v15, %v1060_v14 }
  0x35   : > { %499 = vmatmul.bf16.vlgmr.msra.gmra.mxu1 %v341_v21 }
  0x36   : > { %816 = vmatpush.bf16.msrb.mxu0 %v1061_v20 }
  0x44   : > { %485 = vmatmul.bf16.gmra.mxu0 %v342_v26 }
  0x45   : > { %504 = vmatmul.bf16.gmra.mxu1 %v343_v27 }
  0x8f   : > { %v539_v52 = vpop.permute.xlu0 %538 }
  0x97   : > { %v573_v21 = vpop.permute.xlu0 %572 }
  0x9f   : > { %v598_v9 = vpop.permute.xlu0 %597 }
  0xb1   : > { %v481_v28 = vpop.f32.mrf.mxu0 }
  0xb2   : > { %v500_v29 = vpop.f32.mrf.mxu1 }
  0xb3   : > { %v501_v45 = vadd.f32 %v500_v29, %v481_v28  ;;  %v578_v29 = vpop.permute.xlu1 %577 }
  0xb5   : > { %v514_v48 = vmul.f32 %v1148_v42, %v501_v45 }
  0xb9   : > { %v483_v32 = vpop.f32.mrf.mxu0 }
  0xba   : > { %v502_v33 = vpop.f32.mrf.mxu1 }
  0xbb   : > { %v503_v43 = vadd.f32 %v502_v33, %v483_v32  ;;  %v1045_v32 = vor.u32 %v1094_v30, %v1042_v31 }
  0xbd   : > { %v515_v47 = vmul.f32 %v1148_v42, %v503_v43 }
  0xc1   : > { %v486_v35 = vpop.f32.mrf.mxu0 }
  0xc2   : > { %v505_v36 = vpop.f32.mrf.mxu1 }
  0xc3   : > { %v506_v40 = vadd.f32 %v505_v36, %v486_v35  ;;  %v1098_v36 = vld [vmem:[%s1592_s8 + $0x14] sm:$0xf] }
  0xc5   : > { %v516_v46 = vmul.f32 %v1148_v42, %v506_v40  ;;  %v583_v40 = vpop.permute.xlu1 %582 }
  0xc9   : > { %v488_v38 = vpop.f32.mrf.mxu0 }
  0xca   : > { %v507_v39 = vpop.f32.mrf.mxu1 }
  0xcb   : > { %v508_v41 = vadd.f32 %v507_v39, %v488_v38  ;;  %v1065_v39 = vor.u32 %v1098_v36, %v1062_v37 }
  0xcd   : > { %v517_v44 = vmul.f32 %v1148_v42, %v508_v41  ;;  %835 = vmatpush.bf16.msrb.mxu1 %v1065_v39  ;;  %v603_v15 = vpop.permute.xlu1 %602 }
  0xcf   : > { %557 = vmatpush.msra.mxu2 %v517_v44 }
  0xd1   : > { %558 = vmatpush.msra.mxu2 %v516_v46 }
  0xd3   : > { %559 = vmatpush.msra.mxu2 %v515_v47  ;;  %v1092_v47 = vld [vmem:[%s1591_s7 + $0x4] sm:$0xf] }
  0xd5   : > { %560 = vmatpush.msra.mxu2 %v514_v48  ;;  %v1034_v48 = vld [vmem:[%s1591_s7 + $0x8] sm:$0xf0] }
  0xd6   : > { %1021 = vmatmul.msk.f32.vlgmr.msra.gmra.mxu2 %vm541_vm0, %v518_v49  ;;  %v1037_v49 = vor.u32 %v1092_v47, %v1034_v48 }
  0xd7   : > { %748 = vmatpush.bf16.msrb.mxu2 %v1041_v10 }
  0xdb   : > { %749 = vmatpush.bf16.msrb.mxu2 %v1033_v13 }
  0xdf   : > { %767 = vmatpush.bf16.msra.mxu2 %v1045_v32 }
  0xe3   : > { %768 = vmatpush.bf16.msra.mxu2 %v1037_v49 }
 0x159   : > { %v562_v53 = vpop.f32.mrf.mxu2 }
 0x15a   : > { %v563_v54 = vadd.f32 %v562_v53, %v539_v52  ;;  %v1096_v52 = vld [vmem:[%s1592_s8 + $0x4] sm:$0xf] }
 0x15c   : > { %v565_v55 = vadd.f32 3.0, %v563_v54 }
 0x15e   : > { %v566_v56 = vmax.f32 %v565_v55, 0.0 }
 0x160   : > { %v567_v58 = vmin.f32 %v566_v56, 6.0  ;;  %v1053_v56 = vor.u32 %v1097_v51, %v1052_v50 }
 0x162   : > { %v568_v59 = vmul.f32 0.16666667, %v567_v58  ;;  %v1057_v58 = vor.u32 %v1096_v52, %v1054_v57  ;;  %817 = vmatpush.bf16.msrb.mxu0 %v1053_v56 }
 0x164   : > { %v569_v60 = vmul.f32 %v568_v59, %v563_v54  ;;  %v588_v54 = vpop.permute.xlu2 %587  ;;  %836 = vmatpush.bf16.msrb.mxu1 %v1057_v58 }
 0x166   : > { %650 = vmatpush.msra.mxu3 %v569_v60 }
 0x167   : > { %1022 = vmatmul.msk.f32.vlgmr.msra.gmra.mxu3 %vm610_vm1, %v520_v61 }
 0x168   : > { %1101 = vmatpush.bf16.msrb.mxu3 %v1061_v20 }
 0x16c   : > { %1102 = vmatpush.bf16.msrb.mxu3 %v1053_v56  ;;  %v593_v0 = vpop.permute.xlu2 %592 }
 0x16f   : > { %1023 = vmatmul.msk.f32.gmra.mxu3 %vm610_vm1, %v521_v62 }
 0x174   : > { %v608_v32 = vpop.permute.xlu2 %607 }
 0x177   : > { %1024 = vmatmul.msk.f32.gmra.mxu3 %vm610_vm1, %v522_v63 }
 0x17f   : > { %1025 = vmatmul.msk.f32.gmra.mxu3 %vm610_vm1, %v523_v1 }
 0x187   : > { %1026 = vmatmul.msk.f32.gmra.mxu3 %vm610_vm1, %v524_v3 }
 0x18f   : > { %1027 = vmatmul.msk.f32.gmra.mxu3 %vm610_vm1, %v525_v5 }
 0x197   : > { %1028 = vmatmul.msk.f32.gmra.mxu3 %vm610_vm1, %v526_v6 }
 0x19f   : > { %1029 = vmatmul.msk.f32.gmra.mxu3 %vm610_vm1, %v527_v7 }
 0x1ea   : > { %v652_v26 = vpop.f32.mrf.mxu3 }
 0x1eb   : > { %v653_v27 = vadd.f32 %v652_v26, %v573_v21 }
 0x1ed   : > { %v676_v28 = vmul.f32 0.5, %v653_v27 }
 0x1ef   : > { %1149 = vtanh.f32 %v676_v28 }
 0x1f2   : > { %v655_v33 = vpop.f32.mrf.mxu3 }
 0x1f3   : > { %v656_v34 = vadd.f32 %v655_v33, %v578_v29 }
 0x1f5   : > { %v677_v35 = vmul.f32 0.5, %v656_v34  ;;  %v1150_v38 = vpop.eup %1149 }
 0x1f6   : > { %v692_v43 = vadd.f32 1.0, %v1150_v38 }
 0x1f7   : > { %1151 = vtanh.f32 %v677_v35 }
 0x1f8   : > { %v700_v53 = vmul.f32 0.5, %v692_v43 }
 0x1fa   : > { %v658_v41 = vpop.f32.mrf.mxu3 }
 0x1fb   : > { %v659_v42 = vadd.f32 %v658_v41, %v583_v40 }
 0x1fd   : > { %v1152_v44 = vpop.eup %1151  ;;  %v678_v46 = vmul.f32 0.5, %v659_v42 }
 0x1fe   : > { %v693_v45 = vadd.f32 1.0, %v1152_v44 }
 0x1ff   : > { %1153 = vtanh.f32 %v678_v46 }
 0x200   : > { %v701_v55 = vmul.f32 0.5, %v693_v45 }
 0x202   : > { %v708_v59 = vpack.c.bf16 %v701_v55, %v700_v53  ;;  %v661_v60 = vpop.f32.mrf.mxu3 }
 0x203   : > { %v662_v61 = vadd.f32 %v661_v60, %v588_v54 }
 0x204   : > { %1046 = vmatmul.msk.bf16.vlgmr.msrb.gmra.mxu2 %vm541_vm0, %v708_v59 }
 0x205   : > { %v679_v62 = vmul.f32 0.5, %v662_v61  ;;  %v1154_v63 = vpop.eup %1153 }
 0x206   : > { %v694_v3 = vadd.f32 1.0, %v1154_v63 }
 0x207   : > { %1155 = vtanh.f32 %v679_v62 }
 0x208   : > { %v702_v7 = vmul.f32 0.5, %v694_v3 }
 0x20a   : > { %v664_v1 = vpop.f32.mrf.mxu3 }
 0x20b   : > { %v665_v2 = vadd.f32 %v664_v1, %v593_v0 }
 0x20d   : > { %v1156_v4 = vpop.eup %1155  ;;  %v680_v6 = vmul.f32 0.5, %v665_v2 }
 0x20e   : > { %v695_v5 = vadd.f32 1.0, %v1156_v4 }
 0x20f   : > { %1157 = vtanh.f32 %v680_v6 }
 0x210   : > { %v703_v8 = vmul.f32 0.5, %v695_v5 }
 0x212   : > { %v667_v10 = vpop.f32.mrf.mxu3  ;;  %v709_v11 = vpack.c.bf16 %v703_v8, %v702_v7 }
 0x213   : > { %v668_v12 = vadd.f32 %v667_v10, %v598_v9 }
 0x214   : > { %1047 = vmatmul.msk.bf16.gmra.mxu2 %vm541_vm0, %v709_v11 }
 0x215   : > { %v681_v13 = vmul.f32 0.5, %v668_v12  ;;  %v1158_v14 = vpop.eup %1157 }
 0x216   : > { %v696_v26 = vadd.f32 1.0, %v1158_v14 }
 0x217   : > { %1159 = vtanh.f32 %v681_v13 }
 0x218   : > { %v704_v30 = vmul.f32 0.5, %v696_v26 }
 0x21a   : > { %v670_v20 = vpop.f32.mrf.mxu3 }
 0x21b   : > { %v671_v21 = vadd.f32 %v670_v20, %v603_v15 }
 0x21d   : > { %v1160_v27 = vpop.eup %1159  ;;  %v682_v29 = vmul.f32 0.5, %v671_v21 }
 0x21e   : > { %v697_v28 = vadd.f32 1.0, %v1160_v27 }
 0x21f   : > { %1161 = vtanh.f32 %v682_v29 }
 0x220   : > { %v705_v31 = vmul.f32 0.5, %v697_v28 }
 0x222   : > { %v710_v33 = vpack.c.bf16 %v705_v31, %v704_v30  ;;  %v673_v34 = vpop.f32.mrf.mxu3 }
 0x223   : > { %v674_v35 = vadd.f32 %v673_v34, %v608_v32 }
 0x224   : > { %1048 = vmatmul.msk.bf16.vlgmr.msra.gmra.mxu2 %vm541_vm0, %v708_v59  ;;  %1066 = vmatmul.msk.bf16.vlgmr.msrb.gmra.mxu0 %vm541_vm0, %v710_v33 }
 0x225   : > { %v683_v36 = vmul.f32 0.5, %v674_v35  ;;  %1068 = vmatmul.msk.bf16.vlgmr.msrb.gmra.mxu1 %vm541_vm0, %v710_v33  ;;  %v1162_v37 = vpop.eup %1161 }
 0x226   : > { %v698_v38 = vadd.f32 1.0, %v1162_v37 }
 0x227   : > { %1163 = vtanh.f32 %v683_v36 }
 0x228   : > { %v706_v41 = vmul.f32 0.5, %v698_v38 }
 0x22d   : > { %v1164_v39 = vpop.eup %1163 }
 0x22e   : > { %v699_v40 = vadd.f32 1.0, %v1164_v39 }
 0x230   : > { %v707_v42 = vmul.f32 0.5, %v699_v40 }
 0x232   : > { %v711_v43 = vpack.c.bf16 %v707_v42, %v706_v41 }
 0x234   : > { %1049 = vmatmul.msk.bf16.gmra.mxu2 %vm541_vm0, %v709_v11  ;;  %1067 = vmatmul.msk.bf16.vlgmr.msrb.gmra.mxu3 %vm541_vm0, %v711_v43 }
 0x235   : > { %1069 = vmatmul.msk.bf16.gmra.mxu1 %vm541_vm0, %v711_v43 }
 0x287   : > { %v751_v44 = vpop.f32.mrf.mxu2 }
 0x288   : > { %v848_v48 = vmul.f32 %v751_v44, %v1383_v16 }
 0x28f   : > { %v753_v45 = vpop.f32.mrf.mxu2 }
 0x290   : > { %v850_v53 = vmul.f32 %v753_v45, %v1385_v17 }
 0x297   : > { %v756_v46 = vpop.f32.mrf.mxu2 }
 0x298   : > { %v852_v61 = vmul.f32 %v756_v46, %v1395_v22 }
 0x29f   : > { %v758_v47 = vpop.f32.mrf.mxu2 }
 0x2a1   : > { %v819_v49 = vpop.f32.mrf.mxu0 }
 0x2a2   : > { %v856_v50 = vmul.f32 %v848_v48, %v819_v49  ;;  %v838_v51 = vpop.f32.mrf.mxu1 }
 0x2a4   : > { %864 = vst [vmem:[%s1533_s27] sm:$0xff] %v856_v50 }
 0x2a7   : > { %v770_v52 = vpop.f32.mrf.mxu2 }
 0x2a8   : > { %v849_v54 = vmul.f32 %v770_v52, %v1387_v18 }
 0x2a9   : > { %v821_v55 = vpop.f32.mrf.mxu0 }
 0x2aa   : > { %v857_v56 = vmul.f32 %v849_v54, %v838_v51  ;;  %v858_v57 = vmul.f32 %v850_v53, %v821_v55  ;;  %v840_v16 = vpop.f32.mrf.mxu1 }
 0x2ac   : > { %865 = vst [vmem:[%s1533_s27 + $0x8] sm:$0xff] %v857_v56 }
 0x2ad   : > { %866 = vst [vmem:[%s1533_s27 + $0x10] sm:$0xff] %v858_v57 }
 0x2af   : > { %v772_v58 = vpop.f32.mrf.mxu2 }
 0x2b0   : > { %v851_v59 = vmul.f32 %v772_v58, %v1389_v19  ;;  %v854_v19 = vmul.f32 %v758_v47, %v1397_v23 }
 0x2b2   : > { %v859_v60 = vmul.f32 %v851_v59, %v840_v16  ;;  %v843_v17 = vpop.f32.mrf.mxu1 }
 0x2b4   : > { %867 = vst [vmem:[%s1533_s27 + $0x18] sm:$0xff] %v859_v60 }
 0x2b7   : > { %v775_v62 = vpop.f32.mrf.mxu2  ;;  %v824_v18 = vpop.f32.mrf.mxu3 }
 0x2b8   : > { %v853_v63 = vmul.f32 %v775_v62, %v1399_v24  ;;  %v860_v0 = vmul.f32 %v852_v61, %v824_v18 }
 0x2ba   : > { %v861_v1 = vmul.f32 %v853_v63, %v843_v17  ;;  %868 = vst [vmem:[%s1533_s27 + $0x20] sm:$0xff] %v860_v0  ;;  %v845_v4 = vpop.f32.mrf.mxu1 }
 0x2bc   : > { %869 = vst [vmem:[%s1533_s27 + $0x28] sm:$0xff] %v861_v1 }
 0x2bf   : > { %v777_v22 = vpop.f32.mrf.mxu2  ;;  %v826_v2 = vpop.f32.mrf.mxu3 }
 0x2c0   : > { %v855_v24 = vmul.f32 %v777_v22, %v1401_v25  ;;  %v862_v3 = vmul.f32 %v854_v19, %v826_v2 }
 0x2c2   : > { %v863_v5 = vmul.f32 %v855_v24, %v845_v4  ;;  %870 = vst [vmem:[%s1533_s27 + $0x30] sm:$0xff] %v862_v3 }
 0x2c4   : > { %871 = vst [vmem:[%s1533_s27 + $0x38] sm:$0xff] %v863_v5 }
 0x2c5   : > { %1192 = shalt.err (!%p1189_p3)
}
 0x2c6   : > { %s1230_s25 = smov 256   ;;  %s1231_s27 = smov 16  }
 0x2c7   : > { %1103 = dma.vmem_to_hbm [thread:$0]  (%p1320_p5), %s886_s29, 1024, %s888_s18, %s873_s13, %s1230_s25, %s1230_s25, %s1231_s27  }
 0x2c8 PF: > { %p1109_p4 = scmp.ge.s32.totalorder %s1227_s12, 2  ;;  %s902_s16 = sand.u32 1, %s1215_s30  }
 0x2c9   : > { %s903_s17 = scalar_lea.sflag [#allocation3], %s902_s16 }
 0x2ca   : > { %p1106_p7 = pnand %p1109_p4, %p1324_p6 }
 0x2cc   : > { %p1107_p8 = pneg %p1106_p7 }
 0x2ce   : > { %1210 = dma.done.wait (%p1107_p8), %s903_s17, 1024  }
 0x2cf   : > { %1212 = vsyncadd (%p1107_p8), %s903_s17, 4294966272  ;;  %s1597_s21 = sld [smem:[#allocation5_spill]]  ;;  %p19_p9 = scmp.ge.s32.totalorder %s1307_s15, 4  }
 0x2d0   : > { %s1598_s30 = smov %s1219_s10  ;;  %s1599_s10 = smov %s1223_s11 }
 0x2d1   : > { %s1601_s12 = smov %s1307_s15  ;;  %21 = sbr.rel (!%p19_p9) target bundleno = 3 (0x3), region = 91 }
 0x2d5   : > { %s1600_s11 = smov %s1597_s21 }
 0x2d6   :  { %909 = vsyncpa [#allocation3], 1 }
 0x2d7   :  { %911 = vsyncpa [#allocation3 + $0x1], 1 }

</bundles_post_ra>
